<compile_context>
chip_gen: v7x
topology: tpu7x:2x2x1
jax: 0.10.0
libtpu: 0.0.40
codegen_flags: <defaults>
</compile_context>

<pallas_src>
import math

import jax
import jax.numpy as jnp
from jax import lax
from jax.experimental import pallas as pl
from jax.experimental.pallas import tpu as pltpu


def _layernorm(v, g, b, eps=1e-5):
    mu = jnp.mean(v, axis=-1, keepdims=True)
    var = jnp.mean(jnp.square(v - mu), axis=-1, keepdims=True)
    return (v - mu) * lax.rsqrt(var + eps) * g + b


def _gelu_exact(v):
    # nn.GELU() default (approximate='none').  erf lowers to a VPU polynomial;
    # use the tanh form instead if VALU-bound on v5e (costs exact torch parity).
    return 0.5 * v * (1.0 + lax.erf(v * (1.0 / math.sqrt(2.0))))


def fnet_kernel(x_ref, fs_ref, fe_ref, vecs_ref, w1_ref, w2_ref, o_ref):
    """One grid step = one FNet block applied to one batch tile (all its rows).

    o_ref (constant block index over the block axis) is the resident, carried
    activation: written every block, flushed to HBM after the last block.
    """
    li = pl.program_id(1)                       # block index (sequential axis)

    @pl.when(li == 0)
    def _init():                                # load the input slab once per batch tile
        o_ref[...] = x_ref[...]

    x = o_ref[...]                              # (M, E) f32, M = batch_tile * S
    M, E = x.shape
    S = fs_ref.shape[1]
    H = w1_ref.shape[1]
    bt = M // S

    vecs = vecs_ref[...]                        # (6, max(E, H)) packed per-block vectors
    ln1_g, ln1_b = vecs[0, :E], vecs[1, :E]
    ln2_g, ln2_b = vecs[2, :E], vecs[3, :E]
    b1, b2 = vecs[4, :H], vecs[5, :E]

    # ---- Fourier sublayer: Re(fft2(x)) = C_s X C_e - S_s X S_e (X real) ----
    # Row DFT per batch element (no kron block-diagonal zeros on the MXU).
    # cos half then sin half, accumulated, so only one (S, E) temp is live.
    fs = fs_ref[...]                            # (2S, S) = [C_s; S_s]
    fe = fe_ref[...]                            # (2E, E) = [C_e; -S_e] (sign pre-folded)
    pieces = []
    for b in range(bt):                         # static unroll; bt is small
        xb = x[b * S:(b + 1) * S, :]
        fb = jnp.dot(jnp.dot(fs[:S], xb, preferred_element_type=jnp.float32),
                     fe[:E], preferred_element_type=jnp.float32)
        fb = fb + jnp.dot(jnp.dot(fs[S:], xb, preferred_element_type=jnp.float32),
                          fe[E:], preferred_element_type=jnp.float32)
        pieces.append(fb)
    fft_real = pieces[0] if bt == 1 else jnp.concatenate(pieces, axis=0)

    y = _layernorm(fft_real + x, ln1_g, ln1_b)

    # ---- FeedForward sublayer (bf16 MXU operands, f32 accumulation) ----
    h = jnp.dot(y.astype(w1_ref.dtype), w1_ref[...],
                preferred_element_type=jnp.float32) + b1
    h = _gelu_exact(h)
    # TODO(synk): nn.Dropout treated as identity (inference / eval semantics).
    z = jnp.dot(h.astype(w2_ref.dtype), w2_ref[...],
                preferred_element_type=jnp.float32) + b2
    o_ref[...] = _layernorm(z + y, ln2_g, ln2_b)


def _dft_mats(n):
    # Reduce (k*k) mod n in int32 BEFORE scaling by 2*pi/n (f32-safe phase).
    # (n-1)^2 must fit in int32 -> any realistic S / E is fine.
    assert n < 46341, "int32 overflow in DFT phase table (n too large)"
    k = jnp.arange(n, dtype=jnp.int32)
    kk = (k[:, None] * k[None, :]) % n
    ang = (2.0 * math.pi / n) * kk.astype(jnp.float32)
    return jnp.cos(ang), jnp.sin(ang)


def _vmem_capacity_bytes():
    try:
        return int(pltpu.get_tpu_info().vmem_capacity_bytes)
    except Exception:
        return 64 << 20          # conservative fallback: v7x per-TensorCore VMEM


def _step_vmem_bytes(bt, S, E, H):
    """Per-grid-step VMEM footprint: pipeline buffers + live matmul intermediates."""
    M = bt * S
    f32, bf16 = 4, 2
    P = max(E, H)
    io = 2 * (2 * M * E * f32)                        # x + o slabs, double-buffered
    dft = 2 * (2 * S * S + 2 * E * E) * f32           # row/col DFT operands
    wts = 2 * (2 * E * H * bf16 + 6 * P * f32)        # w1 + w2 + packed vectors
    inter = (3 * M * E * f32                          # fft_real / y / z
             + M * H * (f32 + bf16)                   # h (f32) + bf16 copy
             + M * E * bf16)                          # y bf16 copy
    return io + dft + wts + inter


def fnet_forward(x, params, *, batch_tile=None, ffn_dtype=jnp.bfloat16):
    """Run the full FNet stack (all blocks, all batches) in one pallas_call."""
    B, S, E = x.shape
    L, _, H = params["w1"].shape

    # ---- generation-aware batch-tile selection --------------------------------
    capacity = _vmem_capacity_bytes()
    budget = (capacity * 3) // 4                      # leave compiler headroom
    if batch_tile is None:
        bt = 1
        for cand in range(1, B + 1):
            if B % cand:
                continue
            if B >= 2 and cand > B // 2:              # keep nb >= 2 (v7x: 2 TensorCores)
                continue
            if _step_vmem_bytes(cand, S, E, H) <= budget:
                bt = cand
    else:
        bt = batch_tile
    assert B % bt == 0
    nb = B // bt
    M = bt * S                                        # rows per grid step

    # ---- host-side operand prep ------------------------------------------------
    x_flat = x.reshape(B * S, E)                      # free reshape, E stays lane-minor

    cs_s, sn_s = _dft_mats(S)
    fs = jnp.concatenate([cs_s, sn_s], axis=0)        # (2S, S) = [C_s; S_s]
    cs_e, sn_e = _dft_mats(E)
    fe = jnp.concatenate([cs_e, -sn_e], axis=0)       # (2E, E) = [C_e; -S_e]

    P = max(E, H)

    def pad_vec(v):                                   # (L, 1, n) -> (L, P), zero padded
        v = v.reshape(L, -1)
        return jnp.pad(v, ((0, 0), (0, P - v.shape[-1])))

    vecs = jnp.stack([pad_vec(params["ln1_g"]), pad_vec(params["ln1_b"]),
                      pad_vec(params["ln2_g"]), pad_vec(params["ln2_b"]),
                      pad_vec(params["b1"]), pad_vec(params["b2"])],
                     axis=1)                          # (L, 6, P) f32
    w1 = params["w1"].astype(ffn_dtype)               # (L, E, H) bf16
    w2 = params["w2"].astype(ffn_dtype)               # (L, H, E) bf16

    slab_spec = pl.BlockSpec((M, E), lambda bi, li: (bi, 0))

    def const(shape):
        return pl.BlockSpec(shape, lambda bi, li: (0,) * len(shape))

    def per_block(shape):
        nd = len(shape)
        return pl.BlockSpec((pl.Squeezed(),) + shape,
                            lambda bi, li: (li,) + (0,) * nd)

    footprint = _step_vmem_bytes(bt, S, E, H)
    vmem_limit = int(min(capacity, max(budget, footprint * 5 // 4 + (8 << 20))))

    out_flat = pl.pallas_call(
        fnet_kernel,
        out_shape=jax.ShapeDtypeStruct((B * S, E), jnp.float32),
        grid_spec=pltpu.PrefetchScalarGridSpec(
            num_scalar_prefetch=0,
            grid=(nb, L),                             # (batch tiles, blocks)
            in_specs=[
                slab_spec,                            # x
                const((2 * S, S)),                    # row-DFT [C_s; S_s]
                const((2 * E, E)),                    # col-DFT [C_e; -S_e]
                per_block((6, P)),                    # packed ln/bias vectors
                per_block((E, H)),                    # w1 (bf16)
                per_block((H, E)),                    # w2 (bf16)
            ],
            out_specs=slab_spec,                      # also the carried activation
        ),
        compiler_params=pltpu.CompilerParams(
            dimension_semantics=("parallel", "arbitrary"),
            vmem_limit_bytes=vmem_limit),
    )(x_flat, fs, fe, vecs, w1, w2)

    return out_flat.reshape(B, S, E)


def _init_block(key, E, H):
    k1, k2, k3, k4 = jax.random.split(key, 4)
    # kaiming_normal_(fan_in, leaky_relu, a=0) -> std = sqrt(2 / fan_in)
    std1 = math.sqrt(2.0 / E)
    std2 = math.sqrt(2.0 / H)
    return dict(
        ln1_g=jnp.ones((1, E), jnp.float32), ln1_b=jnp.zeros((1, E), jnp.float32),
        ln2_g=jnp.ones((1, E), jnp.float32), ln2_b=jnp.zeros((1, E), jnp.float32),
        # weights stored as (in, out) = transposed torch Linear.weight
        w1=jax.random.normal(k1, (E, H), jnp.float32) * std1,
        b1=jax.random.uniform(k2, (1, H), jnp.float32, -1.0, 1.0) / math.sqrt(E),
        w2=jax.random.normal(k3, (H, E), jnp.float32) * std2,
        b2=jax.random.uniform(k4, (1, E), jnp.float32, -1.0, 1.0) / math.sqrt(H),
    )


def init_params(key, num_block, E, H):
    keys = jax.random.split(key, num_block)
    blocks = [_init_block(k, E, H) for k in keys]
    return {name: jnp.stack([b[name] for b in blocks], axis=0)
            for name in blocks[0]}


if __name__ == "__main__":
    B, S, E, H, NUM_BLOCK = 2, 8, 32, 64, 2   # batch, seq, embed_size, hidden_size
    key = jax.random.PRNGKey(0)
    kx, kp = jax.random.split(key)
    x = jax.random.normal(kx, (B, S, E), jnp.float32)
    params = init_params(kp, NUM_BLOCK, E, H)

    out = fnet_forward(x, params)
    jax.block_until_ready(out)
    print("KERNEL_OK")
</pallas_src>

<mosaic_0001>
module attributes {stable_mosaic.version = 11 : i64} {
  func.func @fnet_kernel(%arg0: i32, %arg1: i32, %arg2: memref<8x32xf32, #tpu.memory_space<vmem>>, %arg3: memref<16x8xf32, #tpu.memory_space<vmem>>, %arg4: memref<64x32xf32, #tpu.memory_space<vmem>>, %arg5: memref<1x6x64xf32, #tpu.memory_space<vmem>>, %arg6: memref<1x32x64xbf16, #tpu.memory_space<vmem>>, %arg7: memref<1x64x32xbf16, #tpu.memory_space<vmem>>, %arg8: memref<8x32xf32, #tpu.memory_space<vmem>>) attributes {dimension_semantics = [#tpu.dimension_semantics<parallel>, #tpu.dimension_semantics<arbitrary>], iteration_bounds = array<i64: 2, 2>, scalar_prefetch = 0 : i64, scratch_operands = 0 : i64, tpu.core_type = #tpu.core_type<tc>, window_params = [{transform_indices = @transform_0, window_bounds = array<i64: 8, 32>}, {pipeline_mode = #tpu.pipeline_mode<synchronous>, transform_indices = @transform_1, window_bounds = array<i64: 16, 8>}, {pipeline_mode = #tpu.pipeline_mode<synchronous>, transform_indices = @transform_2, window_bounds = array<i64: 64, 32>}, {transform_indices = @transform_3, window_bounds = array<i64: 1, 6, 64>}, {transform_indices = @transform_4, window_bounds = array<i64: 1, 32, 64>}, {transform_indices = @transform_5, window_bounds = array<i64: 1, 64, 32>}, {transform_indices = @transform_6, window_bounds = array<i64: 8, 32>}]} {
    %c0_i32 = arith.constant 0 : i32
    %0 = arith.cmpi eq, %arg1, %c0_i32 : i32
    %1 = arith.extui %0 : i1 to i32
    %c0_i32_0 = arith.constant 0 : i32
    %2 = arith.cmpi ne, %1, %c0_i32_0 : i32
    scf.if %2 {
      %c0_35 = arith.constant 0 : index
      %c0_36 = arith.constant 0 : index
      %102 = vector.load %arg2[%c0_35, %c0_36] : memref<8x32xf32, #tpu.memory_space<vmem>>, vector<8x32xf32>
      %c0_37 = arith.constant 0 : index
      %c0_38 = arith.constant 0 : index
      %103 = vector.load %arg8[%c0_37, %c0_38] : memref<8x32xf32, #tpu.memory_space<vmem>>, vector<8x32xf32>
      tpu.vector_store %arg8[%c0_37, %c0_38], %102 {strides = array<i32>} : memref<8x32xf32, #tpu.memory_space<vmem>>, vector<8x32xf32>,
    } else {
    }
    %c0 = arith.constant 0 : index
    %c0_1 = arith.constant 0 : index
    %3 = vector.load %arg8[%c0, %c0_1] : memref<8x32xf32, #tpu.memory_space<vmem>>, vector<8x32xf32>
    %c0_2 = arith.constant 0 : index
    %c0_3 = arith.constant 0 : index
    %c0_4 = arith.constant 0 : index
    %4 = vector.load %arg5[%c0_2, %c0_3, %c0_4] : memref<1x6x64xf32, #tpu.memory_space<vmem>>, vector<1x6x64xf32>
    %5 = vector.shape_cast %4 : vector<1x6x64xf32> to vector<6x64xf32>
    %6 = vector.extract_strided_slice %5 {offsets = [0, 0], sizes = [1, 32], strides = [1, 1]} : vector<6x64xf32> to vector<1x32xf32>
    %7 = vector.shape_cast %6 : vector<1x32xf32> to vector<32xf32>
    %8 = vector.extract_strided_slice %5 {offsets = [1, 0], sizes = [1, 32], strides = [1, 1]} : vector<6x64xf32> to vector<1x32xf32>
    %9 = vector.shape_cast %8 : vector<1x32xf32> to vector<32xf32>
    %10 = vector.extract_strided_slice %5 {offsets = [2, 0], sizes = [1, 32], strides = [1, 1]} : vector<6x64xf32> to vector<1x32xf32>
    %11 = vector.shape_cast %10 : vector<1x32xf32> to vector<32xf32>
    %12 = vector.extract_strided_slice %5 {offsets = [3, 0], sizes = [1, 32], strides = [1, 1]} : vector<6x64xf32> to vector<1x32xf32>
    %13 = vector.shape_cast %12 : vector<1x32xf32> to vector<32xf32>
    %14 = vector.extract_strided_slice %5 {offsets = [4, 0], sizes = [1, 64], strides = [1, 1]} : vector<6x64xf32> to vector<1x64xf32>
    %15 = vector.shape_cast %14 : vector<1x64xf32> to vector<64xf32>
    %16 = vector.extract_strided_slice %5 {offsets = [5, 0], sizes = [1, 32], strides = [1, 1]} : vector<6x64xf32> to vector<1x32xf32>
    %17 = vector.shape_cast %16 : vector<1x32xf32> to vector<32xf32>
    %c0_5 = arith.constant 0 : index
    %c0_6 = arith.constant 0 : index
    %18 = vector.load %arg3[%c0_5, %c0_6] : memref<16x8xf32, #tpu.memory_space<vmem>>, vector<16x8xf32>
    %c0_7 = arith.constant 0 : index
    %c0_8 = arith.constant 0 : index
    %19 = vector.load %arg4[%c0_7, %c0_8] : memref<64x32xf32, #tpu.memory_space<vmem>>, vector<64x32xf32>
    %20 = vector.extract_strided_slice %18 {offsets = [0, 0], sizes = [8, 8], strides = [1, 1]} : vector<16x8xf32> to vector<8x8xf32>
    %cst = arith.constant dense<0.000000e+00> : vector<8x32xf32>
    %21 = tpu.matmul %20, %3, %cst {dimension_numbers = #tpu.dot_dimension_numbers<[1], [0], [0], [1], [0, 0, 1, 1], [], []>} : vector<8x8xf32>, vector<8x32xf32>, vector<8x32xf32> -> vector<8x32xf32>
    %22 = vector.extract_strided_slice %19 {offsets = [0, 0], sizes = [32, 32], strides = [1, 1]} : vector<64x32xf32> to vector<32x32xf32>
    %cst_9 = arith.constant dense<0.000000e+00> : vector<8x32xf32>
    %23 = tpu.matmul %21, %22, %cst_9 {dimension_numbers = #tpu.dot_dimension_numbers<[1], [0], [0], [1], [0, 0, 1, 1], [], []>} : vector<8x32xf32>, vector<32x32xf32>, vector<8x32xf32> -> vector<8x32xf32>
    %24 = vector.extract_strided_slice %18 {offsets = [8, 0], sizes = [8, 8], strides = [1, 1]} : vector<16x8xf32> to vector<8x8xf32>
    %cst_10 = arith.constant dense<0.000000e+00> : vector<8x32xf32>
    %25 = tpu.matmul %24, %3, %cst_10 {dimension_numbers = #tpu.dot_dimension_numbers<[1], [0], [0], [1], [0, 0, 1, 1], [], []>} : vector<8x8xf32>, vector<8x32xf32>, vector<8x32xf32> -> vector<8x32xf32>
    %26 = vector.extract_strided_slice %19 {offsets = [32, 0], sizes = [32, 32], strides = [1, 1]} : vector<64x32xf32> to vector<32x32xf32>
    %cst_11 = arith.constant dense<0.000000e+00> : vector<8x32xf32>
    %27 = tpu.matmul %25, %26, %cst_11 {dimension_numbers = #tpu.dot_dimension_numbers<[1], [0], [0], [1], [0, 0, 1, 1], [], []>} : vector<8x32xf32>, vector<32x32xf32>, vector<8x32xf32> -> vector<8x32xf32>
    %28 = arith.addf %23, %27 : vector<8x32xf32>
    %29 = arith.addf %28, %3 : vector<8x32xf32>
    %cst_12 = arith.constant dense<0.000000e+00> : vector<8xf32>
    %30 = vector.multi_reduction <add>, %29, %cst_12 [1] : vector<8x32xf32> to vector<8xf32>
    %31 = vector.shape_cast %30 : vector<8xf32> to vector<8x1xf32>
    %cst_13 = arith.constant 3.200000e+01 : f32
    %32 = vector.broadcast %cst_13 : f32 to vector<8x1xf32>
    %33 = arith.divf %31, %32 : vector<8x1xf32>
    %34 = vector.broadcast %33 : vector<8x1xf32> to vector<8x32xf32>
    %35 = arith.subf %29, %34 : vector<8x32xf32>
    %36 = arith.mulf %35, %35 : vector<8x32xf32>
    %cst_14 = arith.constant dense<0.000000e+00> : vector<8xf32>
    %37 = vector.multi_reduction <add>, %36, %cst_14 [1] : vector<8x32xf32> to vector<8xf32>
    %38 = vector.shape_cast %37 : vector<8xf32> to vector<8x1xf32>
    %cst_15 = arith.constant 3.200000e+01 : f32
    %39 = vector.broadcast %cst_15 : f32 to vector<8x1xf32>
    %40 = arith.divf %38, %39 : vector<8x1xf32>
    %41 = vector.broadcast %33 : vector<8x1xf32> to vector<8x32xf32>
    %42 = arith.subf %29, %41 : vector<8x32xf32>
    %cst_16 = arith.constant 9.99999974E-6 : f32
    %43 = vector.broadcast %cst_16 : f32 to vector<8x1xf32>
    %44 = arith.addf %40, %43 : vector<8x1xf32>
    %45 = math.rsqrt %44 : vector<8x1xf32>
    %46 = vector.broadcast %45 : vector<8x1xf32> to vector<8x32xf32>
    %47 = arith.mulf %42, %46 : vector<8x32xf32>
    %48 = vector.shape_cast %7 : vector<32xf32> to vector<1x32xf32>
    %49 = vector.broadcast %48 : vector<1x32xf32> to vector<8x32xf32>
    %50 = arith.mulf %47, %49 : vector<8x32xf32>
    %51 = vector.shape_cast %9 : vector<32xf32> to vector<1x32xf32>
    %52 = vector.broadcast %51 : vector<1x32xf32> to vector<8x32xf32>
    %53 = arith.addf %50, %52 : vector<8x32xf32>
    %54 = arith.truncf %53 : vector<8x32xf32> to vector<8x32xbf16>
    %c0_17 = arith.constant 0 : index
    %c0_18 = arith.constant 0 : index
    %c0_19 = arith.constant 0 : index
    %55 = vector.load %arg6[%c0_17, %c0_18, %c0_19] : memref<1x32x64xbf16, #tpu.memory_space<vmem>>, vector<1x32x64xbf16>
    %56 = vector.shape_cast %55 : vector<1x32x64xbf16> to vector<32x64xbf16>
    %cst_20 = arith.constant dense<0.000000e+00> : vector<8x64xf32>
    %57 = tpu.matmul %54, %56, %cst_20 {dimension_numbers = #tpu.dot_dimension_numbers<[1], [0], [0], [1], [0, 0, 1, 1], [], []>} : vector<8x32xbf16>, vector<32x64xbf16>, vector<8x64xf32> -> vector<8x64xf32>
    %58 = vector.shape_cast %15 : vector<64xf32> to vector<1x64xf32>
    %59 = vector.broadcast %58 : vector<1x64xf32> to vector<8x64xf32>
    %60 = arith.addf %57, %59 : vector<8x64xf32>
    %cst_21 = arith.constant 5.000000e-01 : f32
    %61 = vector.broadcast %cst_21 : f32 to vector<8x64xf32>
    %62 = arith.mulf %61, %60 : vector<8x64xf32>
    %cst_22 = arith.constant 0.707106769 : f32
    %63 = vector.broadcast %cst_22 : f32 to vector<8x64xf32>
    %64 = arith.mulf %60, %63 : vector<8x64xf32>
    %65 = math.erf %64 : vector<8x64xf32>
    %cst_23 = arith.constant 1.000000e+00 : f32
    %66 = vector.broadcast %cst_23 : f32 to vector<8x64xf32>
    %67 = arith.addf %66, %65 : vector<8x64xf32>
    %68 = arith.mulf %62, %67 : vector<8x64xf32>
    %69 = arith.truncf %68 : vector<8x64xf32> to vector<8x64xbf16>
    %c0_24 = arith.constant 0 : index
    %c0_25 = arith.constant 0 : index
    %c0_26 = arith.constant 0 : index
    %70 = vector.load %arg7[%c0_24, %c0_25, %c0_26] : memref<1x64x32xbf16, #tpu.memory_space<vmem>>, vector<1x64x32xbf16>
    %71 = vector.shape_cast %70 : vector<1x64x32xbf16> to vector<64x32xbf16>
    %cst_27 = arith.constant dense<0.000000e+00> : vector<8x32xf32>
    %72 = tpu.matmul %69, %71, %cst_27 {dimension_numbers = #tpu.dot_dimension_numbers<[1], [0], [0], [1], [0, 0, 1, 1], [], []>} : vector<8x64xbf16>, vector<64x32xbf16>, vector<8x32xf32> -> vector<8x32xf32>
    %73 = vector.shape_cast %17 : vector<32xf32> to vector<1x32xf32>
    %74 = vector.broadcast %73 : vector<1x32xf32> to vector<8x32xf32>
    %75 = arith.addf %72, %74 : vector<8x32xf32>
    %76 = arith.addf %75, %53 : vector<8x32xf32>
    %cst_28 = arith.constant dense<0.000000e+00> : vector<8xf32>
    %77 = vector.multi_reduction <add>, %76, %cst_28 [1] : vector<8x32xf32> to vector<8xf32>
    %78 = vector.shape_cast %77 : vector<8xf32> to vector<8x1xf32>
    %cst_29 = arith.constant 3.200000e+01 : f32
    %79 = vector.broadcast %cst_29 : f32 to vector<8x1xf32>
    %80 = arith.divf %78, %79 : vector<8x1xf32>
    %81 = vector.broadcast %80 : vector<8x1xf32> to vector<8x32xf32>
    %82 = arith.subf %76, %81 : vector<8x32xf32>
    %83 = arith.mulf %82, %82 : vector<8x32xf32>
    %cst_30 = arith.constant dense<0.000000e+00> : vector<8xf32>
    %84 = vector.multi_reduction <add>, %83, %cst_30 [1] : vector<8x32xf32> to vector<8xf32>
    %85 = vector.shape_cast %84 : vector<8xf32> to vector<8x1xf32>
    %cst_31 = arith.constant 3.200000e+01 : f32
    %86 = vector.broadcast %cst_31 : f32 to vector<8x1xf32>
    %87 = arith.divf %85, %86 : vector<8x1xf32>
    %88 = vector.broadcast %80 : vector<8x1xf32> to vector<8x32xf32>
    %89 = arith.subf %76, %88 : vector<8x32xf32>
    %cst_32 = arith.constant 9.99999974E-6 : f32
    %90 = vector.broadcast %cst_32 : f32 to vector<8x1xf32>
    %91 = arith.addf %87, %90 : vector<8x1xf32>
    %92 = math.rsqrt %91 : vector<8x1xf32>
    %93 = vector.broadcast %92 : vector<8x1xf32> to vector<8x32xf32>
    %94 = arith.mulf %89, %93 : vector<8x32xf32>
    %95 = vector.shape_cast %11 : vector<32xf32> to vector<1x32xf32>
    %96 = vector.broadcast %95 : vector<1x32xf32> to vector<8x32xf32>
    %97 = arith.mulf %94, %96 : vector<8x32xf32>
    %98 = vector.shape_cast %13 : vector<32xf32> to vector<1x32xf32>
    %99 = vector.broadcast %98 : vector<1x32xf32> to vector<8x32xf32>
    %100 = arith.addf %97, %99 : vector<8x32xf32>
    %c0_33 = arith.constant 0 : index
    %c0_34 = arith.constant 0 : index
    %101 = vector.load %arg8[%c0_33, %c0_34] : memref<8x32xf32, #tpu.memory_space<vmem>>, vector<8x32xf32>
    tpu.vector_store %arg8[%c0_33, %c0_34], %100 {strides = array<i32>} : memref<8x32xf32, #tpu.memory_space<vmem>>, vector<8x32xf32>,
    return
  }
  func.func @transform_0(%arg0: i32, %arg1: i32) -> (i32, i32) {
    %c0_i32 = arith.constant 0 : i32
    %c0_i32_0 = arith.constant 0 : i32
    return %arg0, %c0_i32 : i32, i32
  }
  func.func @transform_1(%arg0: i32, %arg1: i32) -> (i32, i32) {
    %c0_i32 = arith.constant 0 : i32
    %c0_i32_0 = arith.constant 0 : i32
    %c0_i32_1 = arith.constant 0 : i32
    return %c0_i32, %c0_i32_0 : i32, i32
  }
  func.func @transform_2(%arg0: i32, %arg1: i32) -> (i32, i32) {
    %c0_i32 = arith.constant 0 : i32
    %c0_i32_0 = arith.constant 0 : i32
    %c0_i32_1 = arith.constant 0 : i32
    return %c0_i32, %c0_i32_0 : i32, i32
  }
  func.func @transform_3(%arg0: i32, %arg1: i32) -> (i32, i32, i32) {
    %c0_i32 = arith.constant 0 : i32
    %c0_i32_0 = arith.constant 0 : i32
    %c0_i32_1 = arith.constant 0 : i32
    return %arg1, %c0_i32, %c0_i32_0 : i32, i32, i32
  }
  func.func @transform_4(%arg0: i32, %arg1: i32) -> (i32, i32, i32) {
    %c0_i32 = arith.constant 0 : i32
    %c0_i32_0 = arith.constant 0 : i32
    %c0_i32_1 = arith.constant 0 : i32
    return %arg1, %c0_i32, %c0_i32_0 : i32, i32, i32
  }
  func.func @transform_5(%arg0: i32, %arg1: i32) -> (i32, i32, i32) {
    %c0_i32 = arith.constant 0 : i32
    %c0_i32_0 = arith.constant 0 : i32
    %c0_i32_1 = arith.constant 0 : i32
    return %arg1, %c0_i32, %c0_i32_0 : i32, i32, i32
  }
  func.func @transform_6(%arg0: i32, %arg1: i32) -> (i32, i32) {
    %c0_i32 = arith.constant 0 : i32
    %c0_i32_0 = arith.constant 0 : i32
    return %arg0, %c0_i32 : i32, i32
  }
}

</mosaic_0001>

<bundles_post_ra>
// kernel: tpu_custom_call.1
= control target key start
LH: loop header
LB: loop body
LE: loop exit
PB: predicated region body
PF: predicated region fallthrough
CT: control target
= control target key end

     0   :  { %11 = vsyncpa [#allocation3], 0  ;;  %s1523_s0 = inlined_call_operand.vmem [shape: f32[16,32], index: 0, kind: input, shape index: {}]   ;;  %s1524_s1 = inlined_call_operand.vmem [shape: f32[16,8], index: 1, kind: input, shape index: {}]   ;;  %s1525_s2 = inlined_call_operand.vmem [shape: f32[64,32], index: 2, kind: input, shape index: {}]   ;;  %s1526_s3 = inlined_call_operand.vmem [shape: f32[2,6,64], index: 3, kind: input, shape index: {}]   ;;  %s1527_s4 = inlined_call_operand.vmem [shape: bf16[2,32,64], index: 4, kind: input, shape index: {}]   ;;  %s1528_s5 = inlined_call_operand.vmem [shape: bf16[2,64,32], index: 5, kind: input, shape index: {}]   ;;  %s1529_s6 = inlined_call_operand.hbm [shape: f32[16,32], index: 6, kind: output, shape index: {}]  }
   0x1   :  { %13 = vsyncpa [#allocation3 + $0x1], 0  ;;  %s1288_s21 = smov 0   ;;  %s1290_s22 = smov 0  }
   0x2   :  { %s1292_s23 = smov 0   ;;  %s1294_s24 = smov 0  }
   0x3   :  { %s1296_s25 = smov 0   ;;  %s1298_s26 = smov 0  }
   0x4   :  { %s1300_s27 = smov 0   ;;  %s1302_s28 = smov 0  }
   0x5 LB: > { %1536 = sst [smem:[#allocation5_spill]] %s1227_s23  ;;  %s950_s29 = sadd.s32 4294967295, %s1247_s28   ;;  %s1247_s28 = sphi %s1302_s28, %s19_s28   ;;  %s1243_s27 = sphi %s1300_s27, %s1552_s27   ;;  %s1239_s26 = sphi %s1298_s26, %s1551_s26   ;;  %s1235_s25 = sphi %s1296_s25, %s1550_s25   ;;  %s1231_s24 = sphi %s1294_s24, %s1549_s24   ;;  %s1227_s23 = sphi %s1292_s23, %s1548_s23   ;;  %s1223_s22 = sphi %s1290_s22, %s1554_s22   ;;  %s1219_s21 = sphi %s1288_s21, %s1553_s21  }
   0x6   : > { %1537 = sst [smem:[#allocation6_spill]] %s1239_s26  ;;  %s951_s30 = sadd.s32 4294967294, %s1247_s28  }
   0x7   : > { %1538 = sst [smem:[#allocation7_spill]] %s1243_s27  ;;  %s28_s7 = sadd.s32 1, %s1239_s26 }
   0x8   : > { %p29_p0 = scmp.ge.s32.totalorder %s28_s7, 2  ;;  %s31_s8 = sadd.s32 1, %s1243_s27 }
   0x9   : > { %p194_p1 = scmp.ne.s32.totalorder %s1227_s23, %s1223_s22  ;;  %p195_p2 = scmp.eq.s32.totalorder %s950_s29, 3 }
   0xa   : > { %s1556_s7 = smov (%p29_p0, %s28_s7), 0  ;;  %s1558_s8 = smov (!%p29_p0, %s31_s8), %s1243_s27 }
   0xb   : > { %1539 = sst [smem:[#allocation8_spill]] %s1556_s7  ;;  %p1337_p3 = por %p195_p2, %p194_p1 }
   0xc   : > { %p200_p4 = scmp.ne.s32.totalorder %s1223_s22, %s1219_s21  ;;  %p33_p5 = scmp.ge.s32.totalorder %s1558_s8, 2 }
   0xd   : > { %p201_p6 = scmp.eq.s32.totalorder %s951_s30, 3  ;;  %p954_p7 = scmp.ge.s32.totalorder %s1247_s28, 1 }
   0xe   : > { %p255_p8 = scmp.lt.s32.totalorder %s1247_s28, 5  ;;  %s1560_s8 = smov (%p33_p5, %s1558_s8), 0 }
   0xf   : > { %1541 = sst [smem:[#allocation9_spill]] %s1560_s8  ;;  %p1347_p9 = por %p201_p6, %p200_p4 }
  0x10   : > { %p256_p10 = pnand %p954_p7, %p255_p8  ;;  %s181_s11 = ssub.s32 %s1243_s27, %s1560_s8 }
  0x11   : > { %s1542_s10 = scalar_select %p1347_p9, 1, 0 }
  0x12   : > { %s184_s12 = sadd.s32 1, %s1227_s23  ;;  %p182_p11 = scmp.eq.s32.totalorder %s181_s11, 0 }
  0x13   : > { %1543 = sst [smem:[#allocation10_spill]] %s1542_s10  ;;  %259 = sbr.rel (%p256_p10) target bundleno = 1563 (0x61b), region = 44 }
  0x14   : > { %s1355_s13 = scalar_select %p182_p11, %s1227_s23, %s184_s12  }
  0x15   : > { %s1533_s14 = sand.u32 (!%p256_p10), 1, %s1223_s22   ;;  %p298_p12 = scmp.lt.s32.totalorder (!%p256_p10), %s1235_s25, 1 }
  0x16   : > { %1544 = sst [smem:[#allocation11_spill]] %s1355_s13  ;;  %s955_s15 = sshll.u32 (!%p256_p10), %s1533_s14, 3 }
  0x17   : > { %p302_p13 = scmp.lt.s32.totalorder (!%p256_p10), %s1231_s24, 1  ;;  %s1382_s19 = scalar_lea.vmem (!%p256_p10), [#allocation2], %s955_s15 }
  0x18   : > { %p962_p0 = scmp.ne.s32.totalorder (!%p256_p10), %s1231_s24, 0 }
  0x1a   : > { %s299_s16 = scalar_select %p298_p12, %s1235_s25, 1 }
  0x1b   : > { %s303_s17 = scalar_select %p302_p13, %s1231_s24, 1 }
  0x1c   : > { %s956_s18 = sshll.u32 %s299_s16, 3  ;;  %320 = sbr.rel (%p962_p0) target bundleno = 35 (0x23), region = 48  ;;  %vm322_vm0 = vcmask (!%p962_p0), 261120  }
  0x1d   : > { %s301_s29 = scalar_lea.vmem %s1523_s0, %s956_s18  ;;  %s957_s30 = sshll.u32 %s303_s17, 3 }
  0x1e   : > { %s1370_s8 = scalar_lea.vmem %s1526_s3, %s957_s30  ;;  %s979_s7 = sshll.u32 %s303_s17, 4  ;;  %v321_v0 = vld [vmem:[%s301_s29] sm:$0xff] (!%p962_p0) }
  0x1f   : > { %s1375_s13 = scalar_lea.vmem %s1527_s4, %s979_s7  ;;  %s980_s14 = sshll.u32 %s303_s17, 5  ;;  %323 = vst.msk [vmem:[%s1382_s19] sm:$0xff] (!%p962_p0), %vm322_vm0, %v321_v0 }
  0x20   : > { %s1380_s16 = scalar_lea.vmem %s1528_s5, %s980_s14 }
  0x23 PF: > { %v326_v2 = vld [vmem:[%s1524_s1] sm:$0xff]  ;;  %vm336_vm1 = vcmask 64512   ;;  %v1249_v3 = vmov 0.0   ;;  %vm1250_vm2 = vmmov 0   ;;  %v329_v5 = vld [vmem:[%s1525_s2 + $0x8] sm:$0xff]  ;;  %v1251_v8 = vmov 0.0|0.0  }
  0x24   : > { %1003 = vmatprep.subr.mxu0 %v1249_v3  ;;  %1005 = vmatprep.mubr.msk.f32.mxu0 %vm1250_vm2, %v1249_v3  ;;  %v328_v4 = vld [vmem:[%s1525_s2] sm:$0xff]  ;;  %v327_v7 = vld [vmem:[%s1524_s1 + $0x8] sm:$0xff]  ;;  %v330_v11 = vld [vmem:[%s1525_s2 + $0x10] sm:$0xff]  ;;  %vm483_vm3 = vcmask 261120   ;;  %v645_v38 = vlaneseq  ;;  %vm761_vm4 = vcmask 523264   ;;  %s1545_s15 = sand.u32 1, %s1223_s22  }
  0x25   : > { %v332_v6 = vld [vmem:[%s1525_s2 + $0x20] sm:$0xff]  ;;  %1061 = vmatprep.subr.bf16.mxu1 %v1251_v8  ;;  %v1062_v9 = vpack.c.bf16 %v329_v5, %v328_v4  ;;  %v333_v10 = vld [vmem:[%s1525_s2 + $0x28] sm:$0xff]  ;;  %v331_v12 = vld [vmem:[%s1525_s2 + $0x18] sm:$0xff]  ;;  %1032 = vmatprep.mubr.msk.f32.mxu1 %vm1250_vm2, %v1249_v3  ;;  %s831_s17 = scalar_lea.sflag [#allocation3], %s1545_s15 }
  0x26   : > { %v324_v1 = vld [vmem:[%s1382_s19] sm:$0xff]  ;;  %v1056_v13 = vpack.c.bf16 %v333_v10, %v332_v6  ;;  %v1065_v14 = vpack.c.bf16 %v331_v12, %v330_v11  ;;  %v334_v15 = vld [vmem:[%s1525_s2 + $0x30] sm:$0xff]  ;;  %v335_v16 = vld [vmem:[%s1525_s2 + $0x38] sm:$0xff]  ;;  %v1442_v40 = vshrl.u32 %v645_v38, 7 }
  0x27   : > { %1004 = vmatpush3.msra.mxu0 %v324_v1  ;;  %1063 = vmatpush3.bf16.msra.mxu1 %v1062_v9  ;;  %v1059_v17 = vpack.c.bf16 %v335_v16, %v334_v15  ;;  %v1141_v34 = vld [vmem:[%s1375_s13] sm:$0xff]   ;;  %v1142_v35 = vld [vmem:[%s1375_s13 + $0x8] sm:$0xff]   ;;  %v1145_v53 = vld [vmem:[%s1380_s16 + $0x10] sm:$0xff]   ;;  %s844_s13 = sshll.u32 %s1382_s19, 4  ;;  %s1468_s13 = int_to_ptr.vmem [resolvable:$true] %s844_s13 }
  0x28   : > { %1006 = vmatmul.mubr.msk.f32.vlgmr.msra.gmra.mrb[0].mxu0 %vm336_vm1, %v326_v2  ;;  %1008 = vmatprep.subr.mxu0 %v1249_v3  ;;  %v647_v41 = vsub.s32 0, %v1442_v40  ;;  %v325_v42 = vld [vmem:[%s1370_s8] sm:$0x3f]  ;;  %v652_v43 = vsub.s32 1, %v1442_v40  ;;  %v1144_v52 = vld [vmem:[%s1380_s16 + $0x8] sm:$0xff]   ;;  %v1146_v54 = vld [vmem:[%s1380_s16 + $0x18] sm:$0xff]  }
  0x29   : > { %1009 = vmatpush3.msra.mxu0 %v324_v1  ;;  %1010 = vmatprep.mubr.msk.f32.mxu0 %vm1250_vm2, %v1249_v3  ;;  %v1143_v51 = vld [vmem:[%s1380_s16] sm:$0xff]   ;;  %v662_v55 = vsub.s32 4, %v1442_v40  ;;  %s976_s8 = sshll.u32 %s1235_s25, 7  ;;  %s1153_s18 = scalar_lea.vmem %s1468_s13, 128 }
  0x2a   : > { %1055 = vmatprep.subr.bf16.mxu0 %v1251_v8  ;;  %1064 = vmatprep.subr.bf16.mxu1 %v1251_v8  ;;  %v648_v44 = vrot.slane %v325_v42, %v647_v41  ;;  %v653_v47 = vrot.slane %v325_v42, %v652_v43  ;;  %s1466_s14 = scalar_lea.hbm %s1529_s6, %s976_s8  ;;  %p1154_p1 = scmp.ne.s32.totalorder %s1468_s13, %s1153_s18 }
  0x2b   : > { %1066 = vmatpush3.bf16.msra.mxu1 %v1065_v14  ;;  %v663_v56 = vrot.slane %v325_v42, %v662_v55  ;;  %s1252_s25 = smov [#allocation2]  }
  0x2c   : > { %1011 = vmatmul.mubr.msk.f32.vlgmr.msra.gmra.mrb[2].mxu0 %vm336_vm1, %v327_v7  ;;  %1043 = vmatprep.subr.bf16.mxu1 %v1249_v3  ;;  %p1155_p2 = pnand %p1154_p1, %p1337_p3  ;;  %s1157_s20 = sshll.u32 %s1252_s25, 4  ;;  %s1158_s20 = int_to_ptr.vmem [resolvable:$false] %s1157_s20 }
  0x2d   : > { %1057 = vmatpush3.bf16.msra.mxu0 %v1056_v13  ;;  %1021 = vmatprep.mubr.msk.f32.mxu0 %vm1250_vm2, %v1249_v3  ;;  %s1159_s29 = scalar_lea.vmem %s1158_s20, 256  ;;  %p1160_p5 = scmp.lt.s32.totalorder %s1468_s13, %s1158_s20 }
  0x2e   : > { %1058 = vmatprep.subr.bf16.mxu0 %v1251_v8  ;;  %p1156_p4 = pneg %p1155_p2  ;;  %p1161_p6 = scmp.lt.s32.totalorder %s1159_s29, %s1153_s18 }
  0x30   : > { %p1162_p7 = por %p1161_p6, %p1160_p5 }
  0x31   : > { %1060 = vmatpush3.bf16.msra.mxu0 %v1059_v17 }
  0x32   : > { %1035 = vmatprep.subr.bf16.mxu0 %v1249_v3  ;;  %p1163_p8 = pnand %p1162_p7, %p1156_p4 }
  0xfb   : > { %v406_v18 = vpop.f32.mrb[0].mxu0 }
  0xfc   : > { %v1007_v19 = vpop.f32.mrb[1].mxu0  ;;  %1033 = vmatmul.mubr.msk.f32.vlgmr.msra.gmra.mrb[0].mxu1 %vm483_vm3, %v406_v18 }
  0xfd   : > { %1051 = vmatprep.mubr.msk.bf16.mxu1 %vm1250_vm2, %v1249_v3  ;;  %1044 = vmatpush3.bf16.msra.mxu1 %v1143_v51 }
  0xfe   : > { %1045 = vmatprep.subr.bf16.mxu1 %v1249_v3 }
  0xff   : > { %v479_v20 = vpop.f32.mrb[2].mxu0 }
 0x100   : > { %v1012_v21 = vpop.f32.mrb[3].mxu0  ;;  %1022 = vmatmul.mubr.msk.f32.vlgmr.msra.gmra.mrb[4].mxu0 %vm483_vm3, %v479_v20 }
 0x101   : > { %1039 = vmatprep.mubr.msk.bf16.mxu0 %vm1250_vm2, %v1249_v3  ;;  %1036 = vmatpush3.bf16.msra.mxu0 %v1141_v34  ;;  %v821_v21 = vsub.s32 2, %v1442_v40 }
 0x102   : > { %1037 = vmatprep.subr.bf16.mxu0 %v1249_v3  ;;  %1046 = vmatpush3.bf16.msra.mxu1 %v1144_v52 }
 0x103   : > { %1047 = vmatprep.subr.bf16.mxu1 %v1249_v3 }
 0x105   : > { %1038 = vmatpush3.bf16.msra.mxu0 %v1142_v35 }
 0x106   : > { %1048 = vmatpush3.bf16.msra.mxu1 %v1145_v53 }
 0x107   : > { %1049 = vmatprep.subr.bf16.mxu1 %v1249_v3  ;;  %v735_v3 = vsub.s32 5, %v1442_v40 }
 0x109   : > { %v736_v5 = vrot.slane %v325_v42, %v735_v3 }
 0x10a   : > { %1050 = vmatpush3.bf16.msra.mxu1 %v1146_v54 }
 0x1cf   : > { %v626_v22 = vpop.f32.mrb[0].mxu1 }
 0x1d0   : > { %v1034_v23 = vpop.f32.mrb[1].mxu1 }
 0x1d1   : > { %v822_v23 = vrot.slane %v325_v42, %v821_v21 }
 0x1d3   : > { %v553_v24 = vpop.f32.mrb[4].mxu0 }
 0x1d4   : > { %v627_v25 = vadd.f32 %v626_v22, %v553_v24  ;;  %v1023_v26 = vpop.f32.mrb[5].mxu0  ;;  %v826_v22 = vsub.s32 3, %v1442_v40 }
 0x1d6   : > { %v630_v27 = vadd.f32 %v627_v25, %v324_v1  ;;  %v827_v26 = vrot.slane %v325_v42, %v826_v22 }
 0x1d8   : > { %v631_v28 = vsel %vm483_vm3, %v630_v27, 0.0 }
 0x1d9   : > { %632 = vadd.xlane.f32.xlu0 %v631_v28 }
 0x266   : > { %v633_v29 = vpop.xlane.xlu0 %632 }
 0x267   : > { %v635_v30 = vmul.f32 0.03125, %v633_v29 }
 0x269   : > { %v636_v31 = vsub.f32 %v630_v27, %v635_v30 }
 0x26b   : > { %v637_v32 = vmul.f32 %v636_v31, %v636_v31 }
 0x26d   : > { %v638_v33 = vsel %vm483_vm3, %v637_v32, 0.0 }
 0x26e   : > { %639 = vadd.xlane.f32.xlu0 %v638_v33 }
 0x2fb   : > { %v640_v36 = vpop.xlane.xlu0 %639 }
 0x2fc   : > { %v641_v37 = vmul.f32 0.03125, %v640_v36 }
 0x2fe   : > { %v642_v39 = vadd.f32 1e-05, %v641_v37 }
 0x300   : > { %1147 = vrsqrt.f32 %v642_v39 }
 0x30a   : > { %v1148_v45 = vpop.eup %1147 }
 0x30b   : > { %v644_v46 = vmul.f32 %v1148_v45, %v636_v31 }
 0x30d   : > { %v649_v48 = vmul.f32 %v648_v44, %v644_v46 }
 0x30f   : > { %v654_v49 = vadd.f32 %v653_v47, %v649_v48 }
 0x311   : > { %v655_v50 = vpack.c.bf16 %v654_v49, %v654_v49 }
 0x313   : > { %1040 = vmatmul.mubr.msk.bf16.vlgmr.msra.gmra.mrb[8].mxu0 %vm483_vm3, %v655_v50 }
 0x3e6   : > { %v713_v57 = vpop.f32.mrb[8].mxu0 }
 0x3e7   : > { %v714_v58 = vadd.f32 %v713_v57, %v663_v56  ;;  %v1041_v59 = vpop.f32.mrb[9].mxu0 }
 0x3e8   : > { %v716_v60 = vpop.f32.mrb[10].mxu0 }
 0x3e9   : > { %v720_v61 = vmul.f32 0.70710677, %v714_v58  ;;  %v1042_v62 = vpop.f32.mrb[11].mxu0  ;;  %v719_v0 = vmul.f32 0.5, %v714_v58 }
 0x3eb   : > { %1149 = verf.f32 %v720_v61 }
 0x3f5   : > { %v1150_v63 = vpop.eup %1149 }
 0x3f6   : > { %v722_v1 = vadd.f32 1.0, %v1150_v63 }
 0x3f8   : > { %v723_v2 = vmul.f32 %v722_v1, %v719_v0 }
 0x3fa   : > { %v724_v4 = vpack.c.bf16 %v723_v2, %v723_v2 }
 0x3fc   : > { %1052 = vmatmul.mubr.msk.bf16.vlgmr.msra.gmra.mrb[4].mxu1 %vm761_vm4, %v724_v4 }
 0x4cf   : > { %v799_v6 = vpop.f32.mrb[4].mxu1 }
 0x4d0   : > { %v800_v7 = vadd.f32 %v799_v6, %v736_v5  ;;  %v1053_v8 = vpop.f32.mrb[5].mxu1 }
 0x4d1   : > { %v802_v9 = vpop.f32.mrb[6].mxu1 }
 0x4d2   : > { %v1054_v10 = vpop.f32.mrb[7].mxu1  ;;  %v805_v11 = vadd.f32 %v800_v7, %v654_v49 }
 0x4d4   : > { %v806_v12 = vsel %vm483_vm3, %v805_v11, 0.0 }
 0x4d5   : > { %807 = vadd.xlane.f32.xlu1 %v806_v12 }
 0x562   : > { %v808_v13 = vpop.xlane.xlu1 %807 }
 0x563   : > { %v809_v14 = vmul.f32 0.03125, %v808_v13 }
 0x565   : > { %v810_v15 = vsub.f32 %v805_v11, %v809_v14 }
 0x567   : > { %v811_v16 = vmul.f32 %v810_v15, %v810_v15 }
 0x569   : > { %v812_v17 = vsel %vm483_vm3, %v811_v16, 0.0 }
 0x56a   : > { %813 = vadd.xlane.f32.xlu1 %v812_v17 }
 0x5f7   : > { %v814_v18 = vpop.xlane.xlu1 %813 }
 0x5f8   : > { %v815_v19 = vmul.f32 0.03125, %v814_v18 }
 0x5fa   : > { %v816_v20 = vadd.f32 1e-05, %v815_v19 }
 0x5fc   : > { %1151 = vrsqrt.f32 %v816_v20 }
 0x606   : > { %v1152_v24 = vpop.eup %1151 }
 0x607   : > { %v818_v25 = vmul.f32 %v1152_v24, %v810_v15 }
 0x609   : > { %v823_v27 = vmul.f32 %v822_v23, %v818_v25 }
 0x60b   : > { %v828_v28 = vadd.f32 %v827_v26, %v823_v27 }
 0x60d   : > { %829 = vst.msk [vmem:[%s1382_s19] sm:$0xff] %vm483_vm3, %v828_v28 }
 0x60e   : > { %1166 = shalt.err (!%p1163_p8)
}
 0x60f   : > { %s1167_s19 = scalar_lea.hbm %s1466_s14, 128  ;;  %s1171_s12 = scalar_lea.hbm %s1529_s6, 256 }
 0x610   : > { %p1168_p10 = scmp.ne.s32.totalorder %s1466_s14, %s1167_s19  ;;  %p1172_p13 = scmp.lt.u32.totalorder %s1466_s14, %s1529_s6 }
 0x611   : > { %p1173_p0 = scmp.lt.u32.totalorder %s1171_s12, %s1167_s19  ;;  %p1175_p2 = scmp.lt.u32.totalorder %s1167_s19, %s1466_s14 }
 0x612   : > { %p1169_p11 = pnand %p1168_p10, %p1337_p3 }
 0x613   : > { %p1174_p1 = por %p1173_p0, %p1172_p13 }
 0x614   : > { %p1170_p12 = pneg %p1169_p11 }
 0x615   : > { %p1176_p4 = por %p1175_p2, %p1174_p1 }
 0x617   : > { %p1177_p5 = pnand %p1176_p4, %p1170_p12 }
 0x619   : > { %1180 = shalt.err (!%p1177_p5)
}
 0x61a   : > { %1067 = dma.vmem_to_hbm [thread:$0]  (%p1337_p3), %s1468_s13, 128, %s1466_s14, %s831_s17  }
 0x61b PF: > { %p1073_p6 = scmp.ge.s32.totalorder %s1247_s28, 2  ;;  %s856_s24 = sand.u32 1, %s1219_s21  }
 0x61c   : > { %s857_s7 = scalar_lea.sflag [#allocation3], %s856_s24 }
 0x61d   : > { %p1070_p7 = pnand %p1073_p6, %p1347_p9 }
 0x61f   : > { %1214 = dma.done.wait (!%p1070_p7), %s857_s7, 128  }
 0x620   : > { %1216 = vsyncadd (!%p1070_p7), %s857_s7, 4294967168  ;;  %s19_s28 = sadd.s32 1, %s1247_s28   ;;  %s1547_s8 = sld [smem:[#allocation5_spill]] }
 0x621   : > { %p16_p8 = scmp.ge.s32.totalorder %s19_s28, 6   ;;  %s1548_s23 = sld [smem:[#allocation11_spill]] }
 0x622   : > { %s1549_s24 = sld [smem:[#allocation6_spill]]  ;;  %s1550_s25 = sld [smem:[#allocation7_spill]] }
 0x623   : > { %s1551_s26 = sld [smem:[#allocation8_spill]]  ;;  %s1552_s27 = sld [smem:[#allocation9_spill]] }
 0x624   : > { %s1553_s21 = smov %s1223_s22  ;;  %18 = sbr.rel (!%p16_p8) target bundleno = 5 (0x5), region = 92 }
 0x626   : > { %s1554_s22 = smov %s1547_s8 }
 0x62b   :  { %862 = vsyncpa [#allocation3], 1 }
 0x62c   :  { %864 = vsyncpa [#allocation3 + $0x1], 1 }

</bundles_post_ra>
